<compile_context>
chip_gen: v5e
topology: v5e:2x2
jax: 0.10.0
libtpu: 0.0.40
codegen_flags: <defaults>
</compile_context>

<pallas_src>
import functools

import jax
import jax.numpy as jnp
from jax import lax
from jax.experimental import pallas as pl
from jax.experimental.pallas import tpu as pltpu


def _round_up(x, m):
    return (x + m - 1) // m * m


def _choose_tiles(n):
    """Returns (tq, tk) with tq a multiple of tk."""
    if n <= 128:
        return 128, 128
    if n <= 256:
        return 128, 128          # keep nq >= 2 so both v7x TensorCores get work
    if n <= 1024:
        return 256, 256
    return 512, 256              # large batch: big query tile halves key restreaming


def _contrastive_kernel(ek_ref, eq_ref, labk_ref, labq_ref, out_ref,
                        pos_acc, neg_acc, *,
                        n_valid, block_q, block_k, k_full_tiles, needs_mask):
    # ek_ref:   (TK, D)  key-tile embeddings, bf16, L2-normalized
    # eq_ref:   (TQ, D)  query-tile embeddings, bf16, L2-normalized * (1/T)
    # labk_ref: (TK, 1)  key labels (column), int32 (padded rows = -1)
    # labq_ref: (1, TQ)  query labels (row), int32
    # out_ref:  (1, 1, TQ) per-query loss, f32 (lane-dense)
    # pos_acc / neg_acc: (1, TQ) f32 VMEM scratch accumulators
    q = pl.program_id(0)
    k = pl.program_id(1)

    @pl.when(k == 0)
    def _():
        pos_acc[...] = jnp.zeros_like(pos_acc)
        neg_acc[...] = jnp.zeros_like(neg_acc)

    # (TK, TQ) similarity tile on the MXU: contract D of both operands (A·B^T
    # orientation is MXU-native; verified no vxpose is emitted for this layout).
    # 1/temperature is already folded into the query operand by the wrapper.
    sim = lax.dot_general(ek_ref[...], eq_ref[...], (((1,), (1,)), ((), ())),
                          preferred_element_type=jnp.float32)
    exp_sim = jnp.exp(sim)                               # single EUP pass
    same = labk_ref[...] == labq_ref[...]                # (TK, TQ) bool, VPU compare

    def _accumulate(exp_s, same_m, v_count):
        # Reference semantics: masked-out entries contribute exp(0) = 1, padded
        # key rows contribute 0.  Only ONE masked (TK,TQ) select is materialized;
        # the negative sum follows from the identity  neg = S + V - pos.
        pos_c = jnp.where(same_m, exp_s, 1.0)            # (TK, TQ)
        pos_part = jnp.sum(pos_c, axis=0, keepdims=True)  # (1, TQ) sublane reduce
        s_part = jnp.sum(exp_s, axis=0, keepdims=True)    # (1, TQ)
        pos_acc[...] += pos_part
        neg_acc[...] += s_part + (v_count - pos_part)

    if not needs_mask:
        # No padded keys anywhere: select-free fast path on every grid step.
        _accumulate(exp_sim, same, float(block_k))
    else:
        @pl.when(k < k_full_tiles)          # fully-valid key tiles: fast path
        def _():
            _accumulate(exp_sim, same, float(block_k))

        @pl.when(k >= k_full_tiles)         # only tiles that contain padded keys
        def _():
            key_ids = k * block_k + lax.broadcasted_iota(jnp.int32, (block_k, 1), 0)
            valid = key_ids < n_valid                        # (TK, 1)
            exp_m = jnp.where(valid, exp_sim, 0.0)           # padded keys -> 0
            same_m = jnp.logical_or(same, jnp.logical_not(valid))
            v_count = jnp.maximum(
                jnp.minimum(n_valid - k * block_k, block_k), 0).astype(jnp.float32)
            _accumulate(exp_m, same_m, v_count)

    # Diagonal exclusion for the positive sum: only on grid steps whose absolute
    # key/query index ranges overlap (at most ceil(TQ/TK) of the nk steps per q).
    # Subtract exactly what the accumulator picked up at the diagonal (exp_sim)
    # and add back the reference's exp(0) = 1.  Padded diagonal entries only
    # pollute padded query columns, which the wrapper discards.
    q_start = q * block_q
    k_start = k * block_k
    overlap = jnp.logical_and(k_start < q_start + block_q, q_start < k_start + block_k)

    @pl.when(overlap)
    def _():
        key_ids = k_start + lax.broadcasted_iota(jnp.int32, (block_k, 1), 0)
        qry_ids = q_start + lax.broadcasted_iota(jnp.int32, (1, block_q), 1)
        diag = key_ids == qry_ids
        corr = jnp.sum(jnp.where(diag, exp_sim - 1.0, 0.0), axis=0, keepdims=True)
        pos_acc[...] -= corr

    @pl.when(k == pl.num_programs(1) - 1)
    def _():
        out_ref[0] = (-jnp.log(pos_acc[...] + 1e-8)
                      - jnp.log(1.0 - neg_acc[...] + 1e-8))


def contrastive_loss(embeddings, labels, margin=1.0, temperature=0.1):
    """embeddings: (N, D); labels: (N,) int.  Returns scalar float32 loss.

    `margin` is kept for API parity with the PyTorch module (unused in forward).
    """
    del margin
    n, d = embeddings.shape
    inv_temp = 1.0 / float(temperature)

    # Normalize ONCE in the wrapper (fused by XLA into one memory-bound pass),
    # fold 1/temperature into the query operand, cast MXU operands to bf16.
    # F.normalize(p=2): x / max(||x||, 1e-12)  ==  x * rsqrt(max(||x||^2, 1e-24)).
    xf = embeddings.astype(jnp.float32)
    inv_norm = lax.rsqrt(jnp.maximum(jnp.sum(xf * xf, axis=1, keepdims=True), 1e-24))
    k_emb = (xf * inv_norm).astype(jnp.bfloat16)
    q_emb = (xf * (inv_norm * inv_temp)).astype(jnp.bfloat16)

    tq, tk = _choose_tiles(n)
    n_pad = _round_up(n, tq)                    # tq is a multiple of tk
    nq, nk = n_pad // tq, n_pad // tk
    pad = n_pad - n

    k_emb = jnp.pad(k_emb, ((0, pad), (0, 0)))
    q_emb = jnp.pad(q_emb, ((0, pad), (0, 0)))
    lab = jnp.pad(labels.astype(jnp.int32), (0, pad), constant_values=-1)
    lab_col = lab.reshape(n_pad, 1)             # key labels (column)
    lab_row = lab.reshape(1, n_pad)             # query labels (row)

    # VMEM budget per chip generation (~75% of physical, capped at 96 MiB):
    # ~96 MiB on v5e/v6e (128 MiB parts), ~48 MiB on v7x (64 MiB part).
    try:
        vmem_cap = pltpu.get_tpu_info().vmem_capacity_bytes
    except Exception:
        vmem_cap = 64 * 1024 * 1024
    vmem_limit = min(96 * 1024 * 1024, int(vmem_cap) * 3 // 4)

    kernel = functools.partial(
        _contrastive_kernel,
        n_valid=n,
        block_q=tq,
        block_k=tk,
        k_full_tiles=n // tk,                  # key tiles below this index have no padding
        needs_mask=(pad != 0),
    )

    # NOTE: for very large D (>~4-8K) on v7x, add a D grid axis / Buffered(1) on
    # the query spec to keep the resident tiles under the 64 MiB VMEM; not needed
    # at these sizes.
    per_row = pl.pallas_call(
        kernel,
        out_shape=jax.ShapeDtypeStruct((nq, 1, tq), jnp.float32),
        grid_spec=pltpu.PrefetchScalarGridSpec(
            num_scalar_prefetch=0,
            grid=(nq, nk),
            in_specs=[
                pl.BlockSpec((tk, d), lambda q, k: (k, 0)),   # key embedding tile (bf16)
                pl.BlockSpec((tq, d), lambda q, k: (q, 0)),   # query embedding tile (bf16)
                pl.BlockSpec((tk, 1), lambda q, k: (k, 0)),   # key labels (column)
                pl.BlockSpec((1, tq), lambda q, k: (0, q)),   # query labels (row)
            ],
            out_specs=pl.BlockSpec((1, 1, tq), lambda q, k: (q, 0, 0)),
            scratch_shapes=[
                pltpu.VMEM((1, tq), jnp.float32),   # positive exp-sum accumulator
                pltpu.VMEM((1, tq), jnp.float32),   # negative exp-sum accumulator
            ],
        ),
        compiler_params=pltpu.CompilerParams(
            dimension_semantics=("parallel", "arbitrary"),
            vmem_limit_bytes=vmem_limit,
        ),
    )(k_emb, q_emb, lab_col, lab_row)

    # Final mean in the wrapper over the N real query rows (drops padded rows).
    return jnp.mean(per_row.reshape(-1)[:n])


if __name__ == "__main__":
    key = jax.random.PRNGKey(0)
    k_emb, k_lab = jax.random.split(key)

    N, D = 8, 32  # (batch, hidden) embeddings
    embeddings = jax.random.normal(k_emb, (N, D), dtype=jnp.float32)
    labels = jax.random.randint(k_lab, (N,), 0, 3, dtype=jnp.int32)

    loss = contrastive_loss(embeddings, labels, margin=1.0, temperature=0.1)
    jax.block_until_ready(loss)
    print("KERNEL_OK")
</pallas_src>

<mosaic_0001>
module attributes {stable_mosaic.version = 11 : i64} {
  func.func @_contrastive_kernel(%arg0: i32, %arg1: i32, %arg2: memref<128x32xbf16, #tpu.memory_space<vmem>>, %arg3: memref<128x32xbf16, #tpu.memory_space<vmem>>, %arg4: memref<128x1xi32, #tpu.memory_space<vmem>>, %arg5: memref<1x128xi32, #tpu.memory_space<vmem>>, %arg6: memref<1x1x128xf32, #tpu.memory_space<vmem>>, %arg7: memref<1x128xf32, #tpu.memory_space<vmem>>, %arg8: memref<1x128xf32, #tpu.memory_space<vmem>>) attributes {dimension_semantics = [#tpu.dimension_semantics<parallel>, #tpu.dimension_semantics<arbitrary>], iteration_bounds = array<i64: 1, 1>, scalar_prefetch = 0 : i64, scratch_operands = 2 : i64, tpu.core_type = #tpu.core_type<tc>, window_params = [{transform_indices = @transform_0, window_bounds = array<i64: 128, 32>}, {transform_indices = @transform_1, window_bounds = array<i64: 128, 32>}, {transform_indices = @transform_2, window_bounds = array<i64: 128, 1>}, {transform_indices = @transform_3, window_bounds = array<i64: 1, 128>}, {transform_indices = @transform_4, window_bounds = array<i64: 1, 1, 128>}]} {
    %c0_i32 = arith.constant 0 : i32
    %0 = arith.cmpi eq, %arg1, %c0_i32 : i32
    %1 = arith.extui %0 : i1 to i32
    %c0_i32_0 = arith.constant 0 : i32
    %2 = arith.cmpi ne, %1, %c0_i32_0 : i32
    scf.if %2 {
      %cst_18 = arith.constant 0.000000e+00 : f32
      %30 = vector.broadcast %cst_18 : f32 to vector<1x128xf32>
      %c0_19 = arith.constant 0 : index
      %c0_20 = arith.constant 0 : index
      %31 = vector.load %arg7[%c0_19, %c0_20] : memref<1x128xf32, #tpu.memory_space<vmem>>, vector<1x128xf32>
      tpu.vector_store %arg7[%c0_19, %c0_20], %30 {strides = array<i32>} : memref<1x128xf32, #tpu.memory_space<vmem>>, vector<1x128xf32>,
      %cst_21 = arith.constant 0.000000e+00 : f32
      %32 = vector.broadcast %cst_21 : f32 to vector<1x128xf32>
      %c0_22 = arith.constant 0 : index
      %c0_23 = arith.constant 0 : index
      %33 = vector.load %arg8[%c0_22, %c0_23] : memref<1x128xf32, #tpu.memory_space<vmem>>, vector<1x128xf32>
      tpu.vector_store %arg8[%c0_22, %c0_23], %32 {strides = array<i32>} : memref<1x128xf32, #tpu.memory_space<vmem>>, vector<1x128xf32>,
    } else {
    }
    %c0 = arith.constant 0 : index
    %c0_1 = arith.constant 0 : index
    %3 = vector.load %arg2[%c0, %c0_1] : memref<128x32xbf16, #tpu.memory_space<vmem>>, vector<128x32xbf16>
    %c0_2 = arith.constant 0 : index
    %c0_3 = arith.constant 0 : index
    %4 = vector.load %arg3[%c0_2, %c0_3] : memref<128x32xbf16, #tpu.memory_space<vmem>>, vector<128x32xbf16>
    %cst = arith.constant dense<0.000000e+00> : vector<128x128xf32>
    %5 = tpu.matmul %3, %4, %cst {dimension_numbers = #tpu.dot_dimension_numbers<[1], [1], [0], [0], [0, 0, 1, 0], [], []>} : vector<128x32xbf16>, vector<128x32xbf16>, vector<128x128xf32> -> vector<128x128xf32>
    %6 = math.exp %5 : vector<128x128xf32>
    %c0_4 = arith.constant 0 : index
    %c0_5 = arith.constant 0 : index
    %7 = vector.load %arg4[%c0_4, %c0_5] : memref<128x1xi32, #tpu.memory_space<vmem>>, vector<128x1xi32>
    %c0_6 = arith.constant 0 : index
    %c0_7 = arith.constant 0 : index
    %8 = vector.load %arg5[%c0_6, %c0_7] : memref<1x128xi32, #tpu.memory_space<vmem>>, vector<1x128xi32>
    %9 = vector.broadcast %7 : vector<128x1xi32> to vector<128x128xi32>
    %10 = vector.broadcast %8 : vector<1x128xi32> to vector<128x128xi32>
    %11 = arith.cmpi eq, %9, %10 : vector<128x128xi32>
    %c0_i32_8 = arith.constant 0 : i32
    %12 = arith.cmpi slt, %arg1, %c0_i32_8 : i32
    %13 = arith.extui %12 : i1 to i32
    %c0_i32_9 = arith.constant 0 : i32
    %14 = arith.cmpi ne, %13, %c0_i32_9 : i32
    scf.if %14 {
      %cst_18 = arith.constant 1.000000e+00 : f32
      %30 = vector.broadcast %cst_18 : f32 to vector<128x128xf32>
      %31 = arith.select %11, %6, %30 : vector<128x128xi1>, vector<128x128xf32>
      %cst_19 = arith.constant dense<0.000000e+00> : vector<128xf32>
      %32 = vector.multi_reduction <add>, %31, %cst_19 [0] : vector<128x128xf32> to vector<128xf32>
      %33 = vector.shape_cast %32 : vector<128xf32> to vector<1x128xf32>
      %cst_20 = arith.constant dense<0.000000e+00> : vector<128xf32>
      %34 = vector.multi_reduction <add>, %6, %cst_20 [0] : vector<128x128xf32> to vector<128xf32>
      %35 = vector.shape_cast %34 : vector<128xf32> to vector<1x128xf32>
      %c0_21 = arith.constant 0 : index
      %c0_22 = arith.constant 0 : index
      %36 = vector.load %arg7[%c0_21, %c0_22] : memref<1x128xf32, #tpu.memory_space<vmem>>, vector<1x128xf32>
      %37 = arith.addf %36, %33 : vector<1x128xf32>
      %c0_23 = arith.constant 0 : index
      %c0_24 = arith.constant 0 : index
      %38 = vector.load %arg7[%c0_23, %c0_24] : memref<1x128xf32, #tpu.memory_space<vmem>>, vector<1x128xf32>
      tpu.vector_store %arg7[%c0_23, %c0_24], %37 {strides = array<i32>} : memref<1x128xf32, #tpu.memory_space<vmem>>, vector<1x128xf32>,
      %c0_25 = arith.constant 0 : index
      %c0_26 = arith.constant 0 : index
      %39 = vector.load %arg8[%c0_25, %c0_26] : memref<1x128xf32, #tpu.memory_space<vmem>>, vector<1x128xf32>
      %cst_27 = arith.constant 1.280000e+02 : f32
      %40 = vector.broadcast %cst_27 : f32 to vector<1x128xf32>
      %41 = arith.subf %40, %33 : vector<1x128xf32>
      %42 = arith.addf %35, %41 : vector<1x128xf32>
      %43 = arith.addf %39, %42 : vector<1x128xf32>
      %c0_28 = arith.constant 0 : index
      %c0_29 = arith.constant 0 : index
      %44 = vector.load %arg8[%c0_28, %c0_29] : memref<1x128xf32, #tpu.memory_space<vmem>>, vector<1x128xf32>
      tpu.vector_store %arg8[%c0_28, %c0_29], %43 {strides = array<i32>} : memref<1x128xf32, #tpu.memory_space<vmem>>, vector<1x128xf32>,
    } else {
    }
    %c0_i32_10 = arith.constant 0 : i32
    %15 = arith.cmpi sge, %arg1, %c0_i32_10 : i32
    %16 = arith.extui %15 : i1 to i32
    %c0_i32_11 = arith.constant 0 : i32
    %17 = arith.cmpi ne, %16, %c0_i32_11 : i32
    scf.if %17 {
      %c128_i32_18 = arith.constant 128 : i32
      %30 = arith.muli %arg1, %c128_i32_18 : i32
      %31 = tpu.iota {dimensions = array<i32: 0>} : vector<128x1xi32>
      %32 = vector.broadcast %30 : i32 to vector<128x1xi32>
      %33 = arith.addi %32, %31 : vector<128x1xi32>
      %c8_i32 = arith.constant 8 : i32
      %34 = vector.broadcast %c8_i32 : i32 to vector<128x1xi32>
      %35 = arith.cmpi slt, %33, %34 : vector<128x1xi32>
      %cst_19 = arith.constant 0.000000e+00 : f32
      %36 = vector.shape_cast %35 : vector<128x1xi1> to vector<128x1xi1>
      %37 = vector.broadcast %36 : vector<128x1xi1> to vector<128x128xi1>
      %38 = vector.broadcast %cst_19 : f32 to vector<128x128xf32>
      %39 = arith.select %37, %6, %38 : vector<128x128xi1>, vector<128x128xf32>
      %cst_20 = arith.constant dense<true> : vector<128x1xi1>
      %40 = arith.xori %35, %cst_20 : vector<128x1xi1>
      %41 = vector.broadcast %40 : vector<128x1xi1> to vector<128x128xi1>
      %42 = arith.ori %11, %41 : vector<128x128xi1>
      %c128_i32_21 = arith.constant 128 : i32
      %43 = arith.muli %arg1, %c128_i32_21 : i32
      %c8_i32_22 = arith.constant 8 : i32
      %44 = arith.subi %c8_i32_22, %43 : i32
      %c128_i32_23 = arith.constant 128 : i32
      %45 = arith.minsi %44, %c128_i32_23 : i32
      %c0_i32_24 = arith.constant 0 : i32
      %46 = arith.maxsi %45, %c0_i32_24 : i32
      %47 = arith.sitofp %46 : i32 to f32
      %cst_25 = arith.constant 1.000000e+00 : f32
      %48 = vector.broadcast %cst_25 : f32 to vector<128x128xf32>
      %49 = arith.select %42, %39, %48 : vector<128x128xi1>, vector<128x128xf32>
      %cst_26 = arith.constant dense<0.000000e+00> : vector<128xf32>
      %50 = vector.multi_reduction <add>, %49, %cst_26 [0] : vector<128x128xf32> to vector<128xf32>
      %51 = vector.shape_cast %50 : vector<128xf32> to vector<1x128xf32>
      %cst_27 = arith.constant dense<0.000000e+00> : vector<128xf32>
      %52 = vector.multi_reduction <add>, %39, %cst_27 [0] : vector<128x128xf32> to vector<128xf32>
      %53 = vector.shape_cast %52 : vector<128xf32> to vector<1x128xf32>
      %c0_28 = arith.constant 0 : index
      %c0_29 = arith.constant 0 : index
      %54 = vector.load %arg7[%c0_28, %c0_29] : memref<1x128xf32, #tpu.memory_space<vmem>>, vector<1x128xf32>
      %55 = arith.addf %54, %51 : vector<1x128xf32>
      %c0_30 = arith.constant 0 : index
      %c0_31 = arith.constant 0 : index
      %56 = vector.load %arg7[%c0_30, %c0_31] : memref<1x128xf32, #tpu.memory_space<vmem>>, vector<1x128xf32>
      tpu.vector_store %arg7[%c0_30, %c0_31], %55 {strides = array<i32>} : memref<1x128xf32, #tpu.memory_space<vmem>>, vector<1x128xf32>,
      %c0_32 = arith.constant 0 : index
      %c0_33 = arith.constant 0 : index
      %57 = vector.load %arg8[%c0_32, %c0_33] : memref<1x128xf32, #tpu.memory_space<vmem>>, vector<1x128xf32>
      %58 = vector.broadcast %47 : f32 to vector<1x128xf32>
      %59 = arith.subf %58, %51 : vector<1x128xf32>
      %60 = arith.addf %53, %59 : vector<1x128xf32>
      %61 = arith.addf %57, %60 : vector<1x128xf32>
      %c0_34 = arith.constant 0 : index
      %c0_35 = arith.constant 0 : index
      %62 = vector.load %arg8[%c0_34, %c0_35] : memref<1x128xf32, #tpu.memory_space<vmem>>, vector<1x128xf32>
      tpu.vector_store %arg8[%c0_34, %c0_35], %61 {strides = array<i32>} : memref<1x128xf32, #tpu.memory_space<vmem>>, vector<1x128xf32>,
    } else {
    }
    %c128_i32 = arith.constant 128 : i32
    %18 = arith.muli %arg0, %c128_i32 : i32
    %c128_i32_12 = arith.constant 128 : i32
    %19 = arith.muli %arg1, %c128_i32_12 : i32
    %c128_i32_13 = arith.constant 128 : i32
    %20 = arith.addi %18, %c128_i32_13 : i32
    %21 = arith.cmpi slt, %19, %20 : i32
    %c128_i32_14 = arith.constant 128 : i32
    %22 = arith.addi %19, %c128_i32_14 : i32
    %23 = arith.cmpi slt, %18, %22 : i32
    %24 = arith.andi %21, %23 : i1
    %25 = arith.extui %24 : i1 to i32
    %c0_i32_15 = arith.constant 0 : i32
    %26 = arith.cmpi ne, %25, %c0_i32_15 : i32
    scf.if %26 {
      %30 = tpu.iota {dimensions = array<i32: 0>} : vector<128x1xi32>
      %31 = vector.broadcast %19 : i32 to vector<128x1xi32>
      %32 = arith.addi %31, %30 : vector<128x1xi32>
      %33 = tpu.iota {dimensions = array<i32: 1>} : vector<1x128xi32>
      %34 = vector.broadcast %18 : i32 to vector<1x128xi32>
      %35 = arith.addi %34, %33 : vector<1x128xi32>
      %36 = vector.broadcast %32 : vector<128x1xi32> to vector<128x128xi32>
      %37 = vector.broadcast %35 : vector<1x128xi32> to vector<128x128xi32>
      %38 = arith.cmpi eq, %36, %37 : vector<128x128xi32>
      %cst_18 = arith.constant 1.000000e+00 : f32
      %39 = vector.broadcast %cst_18 : f32 to vector<128x128xf32>
      %40 = arith.subf %6, %39 : vector<128x128xf32>
      %cst_19 = arith.constant 0.000000e+00 : f32
      %41 = vector.broadcast %cst_19 : f32 to vector<128x128xf32>
      %42 = arith.select %38, %40, %41 : vector<128x128xi1>, vector<128x128xf32>
      %cst_20 = arith.constant dense<0.000000e+00> : vector<128xf32>
      %43 = vector.multi_reduction <add>, %42, %cst_20 [0] : vector<128x128xf32> to vector<128xf32>
      %44 = vector.shape_cast %43 : vector<128xf32> to vector<1x128xf32>
      %c0_21 = arith.constant 0 : index
      %c0_22 = arith.constant 0 : index
      %45 = vector.load %arg7[%c0_21, %c0_22] : memref<1x128xf32, #tpu.memory_space<vmem>>, vector<1x128xf32>
      %46 = arith.subf %45, %44 : vector<1x128xf32>
      %c0_23 = arith.constant 0 : index
      %c0_24 = arith.constant 0 : index
      %47 = vector.load %arg7[%c0_23, %c0_24] : memref<1x128xf32, #tpu.memory_space<vmem>>, vector<1x128xf32>
      tpu.vector_store %arg7[%c0_23, %c0_24], %46 {strides = array<i32>} : memref<1x128xf32, #tpu.memory_space<vmem>>, vector<1x128xf32>,
    } else {
    }
    %c0_i32_16 = arith.constant 0 : i32
    %27 = arith.cmpi eq, %arg1, %c0_i32_16 : i32
    %28 = arith.extui %27 : i1 to i32
    %c0_i32_17 = arith.constant 0 : i32
    %29 = arith.cmpi ne, %28, %c0_i32_17 : i32
    scf.if %29 {
      %c0_18 = arith.constant 0 : index
      %c0_19 = arith.constant 0 : index
      %30 = vector.load %arg7[%c0_18, %c0_19] : memref<1x128xf32, #tpu.memory_space<vmem>>, vector<1x128xf32>
      %cst_20 = arith.constant 9.99999993E-9 : f32
      %31 = vector.broadcast %cst_20 : f32 to vector<1x128xf32>
      %32 = arith.addf %30, %31 : vector<1x128xf32>
      %33 = math.log %32 : vector<1x128xf32>
      %cst_21 = arith.constant 0.000000e+00 : f32
      %34 = vector.broadcast %cst_21 : f32 to vector<1x128xf32>
      %35 = arith.subf %34, %33 : vector<1x128xf32>
      %c0_22 = arith.constant 0 : index
      %c0_23 = arith.constant 0 : index
      %36 = vector.load %arg8[%c0_22, %c0_23] : memref<1x128xf32, #tpu.memory_space<vmem>>, vector<1x128xf32>
      %cst_24 = arith.constant 1.000000e+00 : f32
      %37 = vector.broadcast %cst_24 : f32 to vector<1x128xf32>
      %38 = arith.subf %37, %36 : vector<1x128xf32>
      %cst_25 = arith.constant 9.99999993E-9 : f32
      %39 = vector.broadcast %cst_25 : f32 to vector<1x128xf32>
      %40 = arith.addf %38, %39 : vector<1x128xf32>
      %41 = math.log %40 : vector<1x128xf32>
      %42 = arith.subf %35, %41 : vector<1x128xf32>
      %c0_26 = arith.constant 0 : index
      %c0_27 = arith.constant 0 : index
      %c0_28 = arith.constant 0 : index
      %43 = vector.load %arg6[%c0_26, %c0_27, %c0_28] : memref<1x1x128xf32, #tpu.memory_space<vmem>>, vector<1x1x128xf32>
      %44 = vector.shape_cast %43 : vector<1x1x128xf32> to vector<1x128xf32>
      %45 = vector.shape_cast %42 : vector<1x128xf32> to vector<1x1x128xf32>
      tpu.vector_store %arg6[%c0_26, %c0_27, %c0_28], %45 {strides = array<i32>} : memref<1x1x128xf32, #tpu.memory_space<vmem>>, vector<1x1x128xf32>,
    } else {
    }
    return
  }
  func.func @transform_0(%arg0: i32, %arg1: i32) -> (i32, i32) {
    %c0_i32 = arith.constant 0 : i32
    %c0_i32_0 = arith.constant 0 : i32
    return %arg1, %c0_i32 : i32, i32
  }
  func.func @transform_1(%arg0: i32, %arg1: i32) -> (i32, i32) {
    %c0_i32 = arith.constant 0 : i32
    %c0_i32_0 = arith.constant 0 : i32
    return %arg0, %c0_i32 : i32, i32
  }
  func.func @transform_2(%arg0: i32, %arg1: i32) -> (i32, i32) {
    %c0_i32 = arith.constant 0 : i32
    %c0_i32_0 = arith.constant 0 : i32
    return %arg1, %c0_i32 : i32, i32
  }
  func.func @transform_3(%arg0: i32, %arg1: i32) -> (i32, i32) {
    %c0_i32 = arith.constant 0 : i32
    %c0_i32_0 = arith.constant 0 : i32
    return %c0_i32, %arg0 : i32, i32
  }
  func.func @transform_4(%arg0: i32, %arg1: i32) -> (i32, i32, i32) {
    %c0_i32 = arith.constant 0 : i32
    %c0_i32_0 = arith.constant 0 : i32
    %c0_i32_1 = arith.constant 0 : i32
    return %arg0, %c0_i32, %c0_i32_0 : i32, i32, i32
  }
}

</mosaic_0001>

<bundles_post_ra>
// kernel: tpu_custom_call.1
= control target key start
LH: loop header
LB: loop body
LE: loop exit
PB: predicated region body
PF: predicated region fallthrough
CT: control target
= control target key end

     0   :  { %vm136_vm0 = vcmask 261120   ;;  %s1151_s0 = inlined_call_operand.vmem [shape: bf16[128,32], index: 0, kind: input, shape index: {}]   ;;  %s1152_s1 = inlined_call_operand.vmem [shape: bf16[128,32], index: 1, kind: input, shape index: {}]   ;;  %s1153_s2 = inlined_call_operand.vmem [shape: s32[128,1], index: 2, kind: input, shape index: {}]   ;;  %s1154_s3 = inlined_call_operand.vmem [shape: s32[1,128], index: 3, kind: input, shape index: {}]   ;;  %s1155_s4 = inlined_call_operand.hbm [shape: f32[1,1,128], index: 4, kind: output, shape index: {}]  }
   0x1   :  { %v912_v0 = vld [vmem:[%s1152_s1 + $0x38] sm:$0xff] }
   0x2   :  { %v183_v1 = vsel %vm136_vm0, %v912_v0, 0 }
   0x3   :  { %9 = vsyncpa [#allocation5], 0  ;;  %185 = vmatpush.bf16.xpose.msra.mxu0 %v183_v1  ;;  %913 = vmatpush.bf16.xpose.msra.mxu1 %v183_v1  ;;  %v911_v2 = vld [vmem:[%s1152_s1 + $0x30] sm:$0xff]  ;;  %v910_v4 = vld [vmem:[%s1152_s1 + $0x28] sm:$0xff]  ;;  %v1004_v16 = vmov 0   ;;  %v1005_v26 = vmov 0.0   ;;  %v668_v49 = vlaneseq }
   0x4   :  { %914 = vmatpush.bf16.xpose.msra.mxu2 %v183_v1  ;;  %915 = vmatpush.bf16.xpose.msra.mxu3 %v183_v1  ;;  %v180_v3 = vsel %vm136_vm0, %v911_v2, 0  ;;  %v177_v5 = vsel %vm136_vm0, %v910_v4, 0  ;;  %v909_v6 = vld [vmem:[%s1152_s1 + $0x20] sm:$0xff]  ;;  %v908_v8 = vld [vmem:[%s1152_s1 + $0x18] sm:$0xff]  ;;  %v907_v10 = vld [vmem:[%s1152_s1 + $0x10] sm:$0xff]  ;;  %s800_s25 = sshll.u32 %s1155_s4, 4  ;;  %s801_s25 = int_to_ptr.hbm [resolvable:$true] %s800_s25 }
   0x5   :  { %v174_v7 = vsel %vm136_vm0, %v909_v6, 0  ;;  %v171_v9 = vsel %vm136_vm0, %v908_v8, 0  ;;  %v168_v11 = vsel %vm136_vm0, %v907_v10, 0  ;;  %v906_v12 = vld [vmem:[%s1152_s1 + $0x8] sm:$0xff]  ;;  %v266_v14 = vld [vmem:[%s1153_s2] sm:$0xff]  ;;  %940 = vset.pattern.permute.xlu0 %v1004_v16  ;;  %v899_v19 = vld [vmem:[%s1151_s0 + $0x10] sm:$0xff] }
   0x6   :  { %v165_v13 = vsel %vm136_vm0, %v906_v12, 0  ;;  %v905_v15 = vld [vmem:[%s1152_s1] sm:$0xff]  ;;  %284 = vperm.xlu0 %940, %v266_v14   ;;  %v903_v21 = vld [vmem:[%s1151_s0 + $0x30] sm:$0xff]  ;;  %v898_v22 = vld [vmem:[%s1151_s0 + $0x8] sm:$0xff]  ;;  %22 = vst [vmem:[#allocation2] sm:$0x1] %v1005_v26 }
   0x7   :  { %v162_v17 = vsel %vm136_vm0, %v905_v15, 0  ;;  %v897_v18 = vld [vmem:[%s1151_s0] sm:$0xff]  ;;  %v900_v23 = vld [vmem:[%s1151_s0 + $0x18] sm:$0xff]  ;;  %v902_v24 = vld [vmem:[%s1151_s0 + $0x28] sm:$0xff]  ;;  %23 = vst [vmem:[#allocation3] sm:$0x1] %v1005_v26 }
   0x8   :  { %v901_v20 = vld [vmem:[%s1151_s0 + $0x20] sm:$0xff]  ;;  %v904_v25 = vld [vmem:[%s1151_s0 + $0x38] sm:$0xff]  ;;  %v1106_v57 = vshrl.u32 %v668_v49, 7  ;;  %v1109_v2 = vand.u32 127, %v668_v49  ;;  %s1006_s0 = smov [#allocation4]  }
   0x9   :  { %v941_v30 = vld [vmem:[%s1154_s3] ss:$0 sm:$0xff]  ;;  %s798_s3 = sshll.u32 %s1006_s0, 4  ;;  %s799_s3 = int_to_ptr.vmem [resolvable:$true] %s798_s3 }
   0xa   :  { %v670_v0 = vadd.s32 8, %v1106_v57  ;;  %v671_v4 = vadd.s32 16, %v1106_v57  ;;  %vm706_vm3 = vcmp.eq.s32.totalorder %v1106_v57, %v1109_v2 }
   0xb   :  { %186 = vmatpush.bf16.xpose.msra.mxu0 %v180_v3  ;;  %916 = vmatpush.bf16.xpose.msra.mxu1 %v180_v3 }
   0xc   :  { %917 = vmatpush.bf16.xpose.msra.mxu2 %v180_v3  ;;  %918 = vmatpush.bf16.xpose.msra.mxu3 %v180_v3  ;;  %vm707_vm2 = vcmp.eq.s32.totalorder %v670_v0, %v1109_v2  ;;  %vm708_vm4 = vcmp.eq.s32.totalorder %v671_v4, %v1109_v2  ;;  %v680_v4 = vadd.s32 88, %v1106_v57 }
   0xd   :  { %v649_v54 = vld [vmem:[#allocation2] sm:$0x1] }
   0xe   :  { %v652_v3 = vld [vmem:[#allocation3] sm:$0x1]  ;;  %vm717_vm13 = vcmp.eq.s32.totalorder %v680_v4, %v1109_v2 }
  0x13   :  { %187 = vmatpush.bf16.xpose.msra.mxu0 %v177_v5  ;;  %919 = vmatpush.bf16.xpose.msra.mxu1 %v177_v5 }
  0x14   :  { %920 = vmatpush.bf16.xpose.msra.mxu2 %v177_v5  ;;  %921 = vmatpush.bf16.xpose.msra.mxu3 %v177_v5 }
  0x1b   :  { %188 = vmatpush.bf16.xpose.msra.mxu0 %v174_v7  ;;  %922 = vmatpush.bf16.xpose.msra.mxu1 %v174_v7 }
  0x1c   :  { %923 = vmatpush.bf16.xpose.msra.mxu2 %v174_v7  ;;  %924 = vmatpush.bf16.xpose.msra.mxu3 %v174_v7 }
  0x23   :  { %189 = vmatpush.bf16.xpose.msra.mxu0 %v171_v9  ;;  %925 = vmatpush.bf16.xpose.msra.mxu1 %v171_v9 }
  0x24   :  { %926 = vmatpush.bf16.xpose.msra.mxu2 %v171_v9  ;;  %927 = vmatpush.bf16.xpose.msra.mxu3 %v171_v9 }
  0x2b   :  { %190 = vmatpush.bf16.xpose.msra.mxu0 %v168_v11  ;;  %928 = vmatpush.bf16.xpose.msra.mxu1 %v168_v11 }
  0x2c   :  { %929 = vmatpush.bf16.xpose.msra.mxu2 %v168_v11  ;;  %930 = vmatpush.bf16.xpose.msra.mxu3 %v168_v11 }
  0x33   :  { %191 = vmatpush.bf16.xpose.msra.mxu0 %v165_v13  ;;  %931 = vmatpush.bf16.xpose.msra.mxu1 %v165_v13 }
  0x34   :  { %932 = vmatpush.bf16.xpose.msra.mxu2 %v165_v13  ;;  %933 = vmatpush.bf16.xpose.msra.mxu3 %v165_v13 }
  0x3b   :  { %192 = vmatpush.bf16.xpose.msra.mxu0 %v162_v17  ;;  %934 = vmatpush.bf16.xpose.msra.mxu1 %v162_v17 }
  0x3c   :  { %935 = vmatpush.bf16.xpose.msra.mxu2 %v162_v17  ;;  %936 = vmatpush.bf16.xpose.msra.mxu3 %v162_v17  ;;  %v672_v17 = vadd.s32 24, %v1106_v57 }
  0x3e   :  { %vm709_vm5 = vcmp.eq.s32.totalorder %v672_v17, %v1109_v2 }
  0x42   :  { %873 = vmatmul.msk.bf16.vlgmr.msra.gmra.mxu0 %vm136_vm0, %v897_v18  ;;  %875 = vmatmul.msk.bf16.vlgmr.msra.gmra.mxu1 %vm136_vm0, %v899_v19  ;;  %v673_v18 = vadd.s32 32, %v1106_v57 }
  0x43   :  { %877 = vmatmul.msk.bf16.vlgmr.msra.gmra.mxu2 %vm136_vm0, %v901_v20  ;;  %879 = vmatmul.msk.bf16.vlgmr.msra.gmra.mxu3 %vm136_vm0, %v903_v21 }
  0x44   :  { %vm710_vm6 = vcmp.eq.s32.totalorder %v673_v18, %v1109_v2 }
  0x52   :  { %874 = vmatmul.msk.bf16.gmra.mxu0 %vm136_vm0, %v898_v22  ;;  %876 = vmatmul.msk.bf16.gmra.mxu1 %vm136_vm0, %v900_v23 }
  0x53   :  { %878 = vmatmul.msk.bf16.gmra.mxu2 %vm136_vm0, %v902_v24  ;;  %880 = vmatmul.msk.bf16.gmra.mxu3 %vm136_vm0, %v904_v25  ;;  %v674_v25 = vadd.s32 40, %v1106_v57 }
  0x55   :  { %vm711_vm7 = vcmp.eq.s32.totalorder %v674_v25, %v1109_v2 }
  0x78   :  { %v285_v31 = vpop.permute.xlu0 %284 }
  0x79   :  { %vm332_vm1 = vcmp.eq.s32.totalorder %v285_v31, %v941_v30 }
  0xbf   :  { %v194_v27 = vpop.f32.mrf.mxu0  ;;  %v204_v28 = vpop.f32.mrf.mxu1 }
  0xc0   :  { %v234_v29 = vmul.f32 1.442695, %v194_v27  ;;  %v242_v56 = vmul.f32 1.442695, %v204_v28 }
  0xc2   :  { %942 = vpow2.f32 %v234_v29 }
  0xc6   :  { %v214_v32 = vpop.f32.mrf.mxu2  ;;  %v1102_v38 = vpop.f32.mrf.mxu3 }
  0xc7   :  { %v196_v33 = vpop.f32.mrf.mxu0  ;;  %v206_v34 = vpop.f32.mrf.mxu1  ;;  %v250_v16 = vmul.f32 1.442695, %v214_v32 }
  0xc8   :  { %v943_v35 = vpop.eup %942  ;;  %v236_v42 = vmul.f32 1.442695, %v196_v33  ;;  %v244_v59 = vmul.f32 1.442695, %v206_v34 }
  0xc9   :  { %v591_v36 = vsel %vm332_vm1, %v943_v35, 1.0  ;;  %v643_v37 = vrot.slane %v943_v35, 4  ;;  %v881_v14 = vadd.f32 -1.0, %v943_v35 }
  0xca   :  { %v622_v39 = vrot.slane %v591_v36, 4  ;;  %944 = vpow2.f32 %v236_v42 }
  0xcb   :  { %v644_v40 = vadd.f32 %v943_v35, %v643_v37  ;;  %v738_v24 = vsel %vm706_vm3, %v881_v14, 0.0  ;;  %v675_v35 = vadd.s32 48, %v1106_v57  ;;  %v682_v14 = vadd.s32 104, %v1106_v57 }
  0xcc   :  { %v623_v41 = vadd.f32 %v622_v39, %v591_v36 }
  0xcd   :  { %v645_v43 = vrot.slane %v644_v40, 2  ;;  %vm712_vm8 = vcmp.eq.s32.totalorder %v675_v35, %v1109_v2  ;;  %vm719_vm15 = vcmp.eq.s32.totalorder %v682_v14, %v1109_v2 }
  0xce   :  { %v624_v44 = vrot.slane %v623_v41, 2  ;;  %v216_v45 = vpop.f32.mrf.mxu2  ;;  %v1104_v55 = vpop.f32.mrf.mxu3 }
  0xcf   :  { %v646_v46 = vadd.f32 %v645_v43, %v644_v40  ;;  %v199_v47 = vpop.f32.mrf.mxu0  ;;  %v209_v48 = vpop.f32.mrf.mxu1  ;;  %v252_v22 = vmul.f32 1.442695, %v216_v45  ;;  %v676_v43 = vadd.s32 56, %v1106_v57  ;;  %v677_v45 = vadd.s32 64, %v1106_v57 }
  0xd0   :  { %v625_v50 = vadd.f32 %v624_v44, %v623_v41  ;;  %v238_v51 = vmul.f32 1.442695, %v199_v47  ;;  %v945_v60 = vpop.eup %944  ;;  %v246_v9 = vmul.f32 1.442695, %v209_v48  ;;  %v258_v41 = vmul.f32 1.442695, %v1102_v38 }
  0xd1   :  { %v647_v53 = vrot.slane %v646_v46, 1  ;;  %v882_v11 = vadd.f32 -1.0, %v945_v60  ;;  %v260_v49 = vmul.f32 1.442695, %v1104_v55  ;;  %vm713_vm9 = vcmp.eq.s32.totalorder %v676_v43, %v1109_v2 }
  0xd2   :  { %v626_v52 = vrot.slane %v625_v50, 1  ;;  %946 = vpow2.f32 %v238_v51  ;;  %vm714_vm10 = vcmp.eq.s32.totalorder %v677_v45, %v1109_v2 }
  0xd3   :  { %v648_v61 = vadd.f32 %v647_v53, %v646_v46  ;;  %948 = vpow2.f32 %v242_v56  ;;  %v739_v19 = vsel %vm707_vm2, %v882_v11, 0.0 }
  0xd4   :  { %v627_v58 = vadd.f32 %v626_v52, %v625_v50  ;;  %950 = vpow2.f32 %v244_v59  ;;  %v754_v29 = vadd.f32 %v739_v19, %v738_v24  ;;  %v678_v50 = vadd.s32 72, %v1106_v57 }
  0xd5   :  { %v683_v19 = vadd.s32 112, %v1106_v57  ;;  %v684_v24 = vadd.s32 120, %v1106_v57 }
  0xd6   :  { %v650_v62 = vadd.f32 %v649_v54, %v627_v58  ;;  %v654_v63 = vsub.f32 8.0, %v627_v58  ;;  %v219_v1 = vpop.f32.mrf.mxu2  ;;  %v229_v20 = vpop.f32.mrf.mxu3  ;;  %vm715_vm11 = vcmp.eq.s32.totalorder %v678_v50, %v1109_v2 }
  0xd7   :  { %v201_v5 = vpop.f32.mrf.mxu0  ;;  %v211_v6 = vpop.f32.mrf.mxu1  ;;  %v254_v30 = vmul.f32 1.442695, %v219_v1  ;;  %v262_v56 = vmul.f32 1.442695, %v229_v20  ;;  %vm720_vm0 = vcmp.eq.s32.totalorder %v683_v19, %v1109_v2  ;;  %vm721_vm1 = vcmp.eq.s32.totalorder %v684_v24, %v1109_v2 }
  0xd8   :  { %v947_v7 = vpop.eup %946  ;;  %651 = vst [vmem:[#allocation2] sm:$0x1] %v650_v62  ;;  %v655_v8 = vadd.f32 %v654_v63, %v648_v61  ;;  %v240_v10 = vmul.f32 1.442695, %v201_v5  ;;  %v248_v13 = vmul.f32 1.442695, %v211_v6 }
  0xd9   :  { %v883_v15 = vadd.f32 -1.0, %v947_v7  ;;  %v949_v21 = vpop.eup %948  ;;  %v679_v61 = vadd.s32 80, %v1106_v57 }
  0xda   :  { %v656_v12 = vadd.f32 %v655_v8, %v652_v3  ;;  %952 = vpow2.f32 %v240_v10  ;;  %v951_v23 = vpop.eup %950  ;;  %v885_v31 = vadd.f32 -1.0, %v949_v21  ;;  %v681_v8 = vadd.s32 96, %v1106_v57 }
  0xdb   :  { %954 = vpow2.f32 %v246_v9  ;;  %v740_v26 = vsel %vm708_vm4, %v883_v15, 0.0  ;;  %v886_v37 = vadd.f32 -1.0, %v951_v23  ;;  %vm716_vm12 = vcmp.eq.s32.totalorder %v679_v61, %v1109_v2 }
  0xdc   :  { %657 = vst [vmem:[#allocation3] sm:$0x1] %v656_v12  ;;  %956 = vpow2.f32 %v248_v13  ;;  %v755_v34 = vadd.f32 %v754_v29, %v740_v26  ;;  %v742_v44 = vsel %vm710_vm6, %v885_v31, 0.0  ;;  %vm718_vm14 = vcmp.eq.s32.totalorder %v681_v8, %v1109_v2 }
  0xdd   :  { %958 = vpow2.f32 %v250_v16  ;;  %v743_v38 = vsel %vm711_vm7, %v886_v37, 0.0 }
  0xde   :  { %v221_v27 = vpop.f32.mrf.mxu2  ;;  %960 = vpow2.f32 %v252_v22  ;;  %v231_v52 = vpop.f32.mrf.mxu3 }
  0xdf   :  { %v256_v36 = vmul.f32 1.442695, %v221_v27  ;;  %962 = vpow2.f32 %v254_v30  ;;  %v264_v62 = vmul.f32 1.442695, %v231_v52 }
  0xe0   :  { %v953_v28 = vpop.eup %952 }
  0xe1   :  { %v884_v32 = vadd.f32 -1.0, %v953_v28  ;;  %v955_v33 = vpop.eup %954  ;;  %964 = vpow2.f32 %v256_v36 }
  0xe2   :  { %v957_v40 = vpop.eup %956  ;;  %v887_v46 = vadd.f32 -1.0, %v955_v33  ;;  %966 = vpow2.f32 %v258_v41  ;;  %v775_v41 = vld [vmem:[#allocation2] sm:$0x1] }
  0xe3   :  { %v741_v39 = vsel %vm709_vm5, %v884_v32, 0.0  ;;  %v959_v47 = vpop.eup %958  ;;  %v888_v51 = vadd.f32 -1.0, %v957_v40  ;;  %968 = vpow2.f32 %v260_v49  ;;  %v786_v43 = vld [vmem:[#allocation3] sm:$0x1] }
  0xe4   :  { %v756_v42 = vadd.f32 %v755_v34, %v741_v39  ;;  %v961_v53 = vpop.eup %960  ;;  %v889_v58 = vadd.f32 -1.0, %v959_v47  ;;  %v744_v59 = vsel %vm712_vm8, %v887_v46, 0.0  ;;  %970 = vpow2.f32 %v262_v56 }
  0xe5   :  { %v963_v60 = vpop.eup %962  ;;  %v890_v63 = vadd.f32 -1.0, %v961_v53  ;;  %v745_v0 = vsel %vm713_vm9, %v888_v51, 0.0  ;;  %972 = vpow2.f32 %v264_v62 }
  0xe6   :  { %v757_v48 = vadd.f32 %v756_v42, %v742_v44  ;;  %v746_v5 = vsel %vm714_vm10, %v889_v58, 0.0  ;;  %v891_v6 = vadd.f32 -1.0, %v963_v60  ;;  %v787_v44 = vsub.f32 1.0, %v786_v43 }
  0xe7   :  { %v965_v1 = vpop.eup %964  ;;  %v747_v10 = vsel %vm715_vm11, %v890_v63, 0.0 }
  0xe8   :  { %v758_v54 = vadd.f32 %v757_v48, %v743_v38  ;;  %v967_v7 = vpop.eup %966  ;;  %v892_v11 = vadd.f32 -1.0, %v965_v1  ;;  %v748_v16 = vsel %vm716_vm12, %v891_v6, 0.0  ;;  %v788_v45 = vadd.f32 1e-08, %v787_v44 }
  0xe9   :  { %v969_v12 = vpop.eup %968  ;;  %v893_v15 = vadd.f32 -1.0, %v967_v7 }
  0xea   :  { %v759_v55 = vadd.f32 %v758_v54, %v744_v59  ;;  %v971_v17 = vpop.eup %970  ;;  %v894_v20 = vadd.f32 -1.0, %v969_v12  ;;  %v749_v21 = vsel %vm717_vm13, %v892_v11, 0.0  ;;  %974 = vlog2.f32 %v788_v45 }
  0xeb   :  { %v973_v22 = vpop.eup %972  ;;  %v750_v25 = vsel %vm718_vm14, %v893_v15, 0.0  ;;  %v895_v26 = vadd.f32 -1.0, %v971_v17 }
  0xec   :  { %v760_v3 = vadd.f32 %v759_v55, %v745_v0  ;;  %v751_v28 = vsel %vm719_vm15, %v894_v20, 0.0  ;;  %v896_v29 = vadd.f32 -1.0, %v973_v22 }
  0xed   :  { %v752_v31 = vsel %vm720_vm0, %v895_v26, 0.0 }
  0xee   :  { %v761_v9 = vadd.f32 %v760_v3, %v746_v5  ;;  %v753_v33 = vsel %vm721_vm1, %v896_v29, 0.0 }
  0xf0   :  { %v762_v13 = vadd.f32 %v761_v9, %v747_v10  ;;  %v975_v2 = vpop.eup %974 }
  0xf1   :  { %v790_v50 = vmul.f32 0.6931472, %v975_v2 }
  0xf2   :  { %v763_v18 = vadd.f32 %v762_v13, %v748_v16 }
  0xf4   :  { %v764_v23 = vadd.f32 %v763_v18, %v749_v21 }
  0xf6   :  { %v765_v27 = vadd.f32 %v764_v23, %v750_v25 }
  0xf8   :  { %v766_v30 = vadd.f32 %v765_v27, %v751_v28 }
  0xfa   :  { %v767_v32 = vadd.f32 %v766_v30, %v752_v31 }
  0xfc   :  { %v768_v34 = vadd.f32 %v767_v32, %v753_v33 }
  0xfe   :  { %v769_v35 = vrot.slane %v768_v34, 4 }
 0x100   :  { %v770_v36 = vadd.f32 %v769_v35, %v768_v34 }
 0x102   :  { %v771_v37 = vrot.slane %v770_v36, 2 }
 0x104   :  { %v772_v39 = vadd.f32 %v771_v37, %v770_v36 }
 0x106   :  { %v773_v40 = vrot.slane %v772_v39, 1 }
 0x108   :  { %v774_v57 = vadd.f32 %v773_v40, %v772_v39 }
 0x10a   :  { %v776_v42 = vsub.f32 %v775_v41, %v774_v57 }
 0x10c   :  { %777 = vst [vmem:[#allocation2] sm:$0x1] %v776_v42 }
 0x113   :  { %v781_v46 = vld [vmem:[#allocation2] sm:$0x1] }
 0x114   :  { %v782_v47 = vadd.f32 1e-08, %v781_v46 }
 0x116   :  { %976 = vlog2.f32 %v782_v47 }
 0x11c   :  { %v977_v48 = vpop.eup %976 }
 0x11d   :  { %v784_v49 = vmul.f32 0.6931472, %v977_v48 }
 0x11f   :  { %v785_v38 = vsub.f32 0.0, %v784_v49 }
 0x121   :  { %v791_v51 = vsub.f32 %v785_v38, %v790_v50 }
 0x123   :  { %792 = vst [vmem:[#allocation4] sm:$0x1] %v791_v51 }
 0x124   :  { %803 = dma.vmem_to_hbm [thread:$0]  %s799_s3, 16, %s801_s25, [#allocation5]  }
 0x125   :  { %1002 = dma.done.wait [#allocation5], 16  }
 0x126   :  { %1003 = vsyncadd [#allocation5], 4294967280 }
 0x127   :  { %808 = vsyncpa [#allocation5], 1 }

</bundles_post_ra>
